<compile_context>
chip_gen: v6e
topology: v6e:2x2x1
jax: 0.10.0
libtpu: 0.0.40
codegen_flags: <defaults>
</compile_context>

<pallas_src>
import jax
import jax.numpy as jnp
from jax.experimental import pallas as pl
from jax.experimental.pallas import tpu as pltpu


def mlp_kernel(x_ref, w1_ref, b1_ref, w2_ref, b2_ref, w3_ref, b3_ref, o_ref):
    # Layer 1: Linear(D_in, 256) -> ReLU      (BN1 folded into w2/b2 by the wrapper)
    h = jnp.dot(x_ref[...], w1_ref[...], preferred_element_type=jnp.float32) + b1_ref[...]
    h = jnp.maximum(h, 0.0).astype(w2_ref.dtype)
    # Dropout(0.5) -> identity in eval mode.

    # Layer 2: Linear(256, 128) -> ReLU       (BN2 folded into w3/b3 by the wrapper)
    h = jnp.dot(h, w2_ref[...], preferred_element_type=jnp.float32) + b2_ref[...]
    h = jnp.maximum(h, 0.0).astype(w3_ref.dtype)
    # Dropout(0.4) -> identity in eval mode.

    # Layer 3: Linear(128, C_pad) -> logits (f32 accumulate, bf16 lane-dense store)
    o_ref[...] = (jnp.dot(h, w3_ref[...], preferred_element_type=jnp.float32)
                  + b3_ref[...]).astype(o_ref.dtype)


def _round_up(v, m):
    return ((v + m - 1) // m) * m


_MAX_TB = 2048  # per-step working set (x + out tiles + f32 intermediates) stays well under 10 MiB


def _choose_tb(B):
    """Batch-tile size: big tiles to amortize per-step overhead, but >=2 (even) grid steps for
    B > 16 so v7x's two TensorCores are both used under "parallel" semantics."""
    if B <= 16:
        return 16
    n_steps = max(2, -(-B // _MAX_TB))
    if n_steps % 2:
        n_steps += 1                      # even step count -> balanced across 2 TCs on v7x
    return min(_round_up(-(-B // n_steps), 16), _MAX_TB)


def mlp_classifier_forward(x, params, *, compute_dtype=jnp.bfloat16):
    """x: [B, input_dim] -> logits [B, num_classes] float32 (eval-mode semantics)."""
    eps = 1e-5
    B, D_in = x.shape
    H1 = params["w1"].shape[1]
    H2 = params["w2"].shape[1]
    C = params["w3"].shape[1]

    # BatchNorm1d (eval, running stats) -> per-feature scale/shift.
    s1 = params["bn1_gamma"] / jnp.sqrt(params["bn1_var"] + eps)
    t1 = params["bn1_beta"] - params["bn1_mean"] * s1
    s2 = params["bn2_gamma"] / jnp.sqrt(params["bn2_var"] + eps)
    t2 = params["bn2_beta"] - params["bn2_mean"] * s2

    # Fold the BN affine (which follows the ReLU in this module) into the NEXT layer's
    # weights/bias -- a one-time XLA-side transform.
    w1 = params["w1"].astype(jnp.float32)
    b1 = params["b1"].astype(jnp.float32)
    w2f = s1[:, None] * params["w2"]
    b2f = t1 @ params["w2"] + params["b2"]
    w3f = s2[:, None] * params["w3"]
    b3f = t2 @ params["w3"] + params["b3"]

    # Pad the class dim to a lane-dense multiple of 128 (zero columns -> zero logits, sliced off).
    C_pad = _round_up(max(C, 128), 128)
    w3f = jnp.pad(w3f, ((0, 0), (0, C_pad - C)))
    b3f = jnp.pad(b3f, (0, C_pad - C))

    # Batch tiling.
    TB = _choose_tb(B)
    B_pad = _round_up(B, TB)

    xp = x.astype(compute_dtype)
    if B_pad != B:
        xp = jnp.pad(xp, ((0, B_pad - B), (0, 0)))

    def row(v):  # per-feature vector as a (1, N) f32 row, broadcast over the batch tile.
        return v.reshape(1, -1).astype(jnp.float32)

    args = (
        xp,
        w1.astype(compute_dtype), row(b1),
        w2f.astype(compute_dtype), row(b2f),
        w3f.astype(compute_dtype), row(b3f),
    )

    def const_spec(shape):
        # Block index never changes -> keep the operand VMEM-resident and single-buffered.
        return pl.BlockSpec(shape, lambda i: (0, 0), pipeline_mode=pl.Buffered(1))

    in_specs = [
        pl.BlockSpec((TB, D_in), lambda i: (i, 0)),   # batch-tiled activations (double-buffered)
        const_spec((D_in, H1)), const_spec((1, H1)),
        const_spec((H1, H2)), const_spec((1, H2)),
        const_spec((H2, C_pad)), const_spec((1, C_pad)),
    ]
    out_spec = pl.BlockSpec((TB, C_pad), lambda i: (i, 0))

    out = pl.pallas_call(
        mlp_kernel,
        out_shape=jax.ShapeDtypeStruct((B_pad, C_pad), compute_dtype),  # bf16 writeback
        grid=(B_pad // TB,),
        in_specs=in_specs,
        out_specs=out_spec,
        compiler_params=pltpu.CompilerParams(
            dimension_semantics=("parallel",),
            vmem_limit_bytes=48 * 1024 * 1024,   # < v7x's 64 MiB physical; ample on v5e/v6e
        ),
    )(*args)

    return out[:B, :C].astype(jnp.float32)


def init_params(key, input_dim, num_classes):
    """Deterministic synthetic init mirroring the PyTorch module's parameter shapes.

    Weights are stored as [in_features, out_features] (transpose of torch's [out, in]);
    x @ W + b is identical to torch's x @ W_t.T + b.
    """
    k = jax.random.split(key, 6)

    def lin(kk, fan_in, fan_out):
        bound = 1.0 / jnp.sqrt(fan_in)
        kw, kb = jax.random.split(kk)
        w = jax.random.uniform(kw, (fan_in, fan_out), jnp.float32, -bound, bound)
        b = jax.random.uniform(kb, (fan_out,), jnp.float32, -bound, bound)
        return w, b

    w1, b1 = lin(k[0], input_dim, 256)
    w2, b2 = lin(k[1], 256, 128)
    w3, b3 = lin(k[2], 128, num_classes)

    params = dict(
        w1=w1, b1=b1,
        w2=w2, b2=b2,
        w3=w3, b3=b3,
        # BatchNorm1d stats/affine, slightly perturbed so the BN path is actually exercised.
        bn1_gamma=jnp.ones((256,), jnp.float32) + 0.01 * jax.random.normal(k[3], (256,)),
        bn1_beta=0.01 * jax.random.normal(k[3], (256,)),
        bn1_mean=0.05 * jax.random.normal(k[4], (256,)),
        bn1_var=jnp.ones((256,), jnp.float32) + 0.05 * jnp.abs(jax.random.normal(k[4], (256,))),
        bn2_gamma=jnp.ones((128,), jnp.float32) + 0.01 * jax.random.normal(k[5], (128,)),
        bn2_beta=0.01 * jax.random.normal(k[5], (128,)),
        bn2_mean=0.05 * jax.random.normal(k[5], (128,)),
        bn2_var=jnp.ones((128,), jnp.float32) + 0.05 * jnp.abs(jax.random.normal(k[5], (128,))),
    )
    return params


def _reference(x, params):
    # Linear -> ReLU -> BN(eval) -> [Dropout: identity] -> Linear -> ReLU -> BN(eval) -> Linear
    eps = 1e-5
    h = jnp.maximum(x @ params["w1"] + params["b1"], 0.0)
    h = (h - params["bn1_mean"]) / jnp.sqrt(params["bn1_var"] + eps) * params["bn1_gamma"] + params["bn1_beta"]
    h = jnp.maximum(h @ params["w2"] + params["b2"], 0.0)
    h = (h - params["bn2_mean"]) / jnp.sqrt(params["bn2_var"] + eps) * params["bn2_gamma"] + params["bn2_beta"]
    return h @ params["w3"] + params["b3"]


if __name__ == "__main__":
    key = jax.random.PRNGKey(0)
    k_in, k_in2, k_par = jax.random.split(key, 3)

    input_dim = 32
    num_classes = 10
    params = init_params(k_par, input_dim, num_classes)

    # Small primary check (B=8 -> single 16-row tile).
    x = jax.random.normal(k_in, (8, input_dim), jnp.float32)
    logits = mlp_classifier_forward(x, params)
    jax.block_until_ready(logits)
    ref = _reference(x, params)
    assert logits.shape == (8, num_classes)
    # bf16 matmuls + bf16 logit writeback vs f32 reference -> loose tolerance.
    assert jnp.allclose(logits, ref, atol=5e-2, rtol=5e-2), "mismatch vs reference (B=8)"

    # Larger check exercising the 2-step grid + padding path (B=600 -> TB=304, grid=(2,)).
    x2 = jax.random.normal(k_in2, (600, input_dim), jnp.float32)
    logits2 = mlp_classifier_forward(x2, params)
    jax.block_until_ready(logits2)
    ref2 = _reference(x2, params)
    assert logits2.shape == (600, num_classes)
    assert jnp.allclose(logits2, ref2, atol=5e-2, rtol=5e-2), "mismatch vs reference (B=600)"

    print("KERNEL_OK")
</pallas_src>

<mosaic_0001>
module attributes {stable_mosaic.version = 11 : i64} {
  func.func @mlp_kernel(%arg0: i32, %arg1: memref<16x32xbf16, #tpu.memory_space<vmem>>, %arg2: memref<32x256xbf16, #tpu.memory_space<vmem>>, %arg3: memref<1x256xf32, #tpu.memory_space<vmem>>, %arg4: memref<256x128xbf16, #tpu.memory_space<vmem>>, %arg5: memref<1x128xf32, #tpu.memory_space<vmem>>, %arg6: memref<128x128xbf16, #tpu.memory_space<vmem>>, %arg7: memref<1x128xf32, #tpu.memory_space<vmem>>, %arg8: memref<16x128xbf16, #tpu.memory_space<vmem>>) attributes {dimension_semantics = [#tpu.dimension_semantics<parallel>], iteration_bounds = array<i64: 1>, scalar_prefetch = 0 : i64, scratch_operands = 0 : i64, tpu.core_type = #tpu.core_type<tc>, window_params = [{transform_indices = @transform_0, window_bounds = array<i64: 16, 32>}, {pipeline_mode = #tpu.pipeline_mode<synchronous>, transform_indices = @transform_1, window_bounds = array<i64: 32, 256>}, {pipeline_mode = #tpu.pipeline_mode<synchronous>, transform_indices = @transform_2, window_bounds = array<i64: 1, 256>}, {pipeline_mode = #tpu.pipeline_mode<synchronous>, transform_indices = @transform_3, window_bounds = array<i64: 256, 128>}, {pipeline_mode = #tpu.pipeline_mode<synchronous>, transform_indices = @transform_4, window_bounds = array<i64: 1, 128>}, {pipeline_mode = #tpu.pipeline_mode<synchronous>, transform_indices = @transform_5, window_bounds = array<i64: 128, 128>}, {pipeline_mode = #tpu.pipeline_mode<synchronous>, transform_indices = @transform_6, window_bounds = array<i64: 1, 128>}, {transform_indices = @transform_7, window_bounds = array<i64: 16, 128>}]} {
    %c0 = arith.constant 0 : index
    %c0_0 = arith.constant 0 : index
    %0 = vector.load %arg1[%c0, %c0_0] : memref<16x32xbf16, #tpu.memory_space<vmem>>, vector<16x32xbf16>
    %c0_1 = arith.constant 0 : index
    %c0_2 = arith.constant 0 : index
    %1 = vector.load %arg2[%c0_1, %c0_2] : memref<32x256xbf16, #tpu.memory_space<vmem>>, vector<32x256xbf16>
    %cst = arith.constant dense<0.000000e+00> : vector<16x256xf32>
    %2 = tpu.matmul %0, %1, %cst {dimension_numbers = #tpu.dot_dimension_numbers<[1], [0], [0], [1], [0, 0, 1, 1], [], []>} : vector<16x32xbf16>, vector<32x256xbf16>, vector<16x256xf32> -> vector<16x256xf32>
    %c0_3 = arith.constant 0 : index
    %c0_4 = arith.constant 0 : index
    %3 = vector.load %arg3[%c0_3, %c0_4] : memref<1x256xf32, #tpu.memory_space<vmem>>, vector<1x256xf32>
    %4 = vector.broadcast %3 : vector<1x256xf32> to vector<16x256xf32>
    %5 = arith.addf %2, %4 : vector<16x256xf32>
    %cst_5 = arith.constant 0.000000e+00 : f32
    %6 = vector.broadcast %cst_5 : f32 to vector<16x256xf32>
    %7 = arith.maximumf %5, %6 : vector<16x256xf32>
    %8 = arith.truncf %7 : vector<16x256xf32> to vector<16x256xbf16>
    %c0_6 = arith.constant 0 : index
    %c0_7 = arith.constant 0 : index
    %9 = vector.load %arg4[%c0_6, %c0_7] : memref<256x128xbf16, #tpu.memory_space<vmem>>, vector<256x128xbf16>
    %cst_8 = arith.constant dense<0.000000e+00> : vector<16x128xf32>
    %10 = tpu.matmul %8, %9, %cst_8 {dimension_numbers = #tpu.dot_dimension_numbers<[1], [0], [0], [1], [0, 0, 1, 1], [], []>} : vector<16x256xbf16>, vector<256x128xbf16>, vector<16x128xf32> -> vector<16x128xf32>
    %c0_9 = arith.constant 0 : index
    %c0_10 = arith.constant 0 : index
    %11 = vector.load %arg5[%c0_9, %c0_10] : memref<1x128xf32, #tpu.memory_space<vmem>>, vector<1x128xf32>
    %12 = vector.broadcast %11 : vector<1x128xf32> to vector<16x128xf32>
    %13 = arith.addf %10, %12 : vector<16x128xf32>
    %cst_11 = arith.constant 0.000000e+00 : f32
    %14 = vector.broadcast %cst_11 : f32 to vector<16x128xf32>
    %15 = arith.maximumf %13, %14 : vector<16x128xf32>
    %16 = arith.truncf %15 : vector<16x128xf32> to vector<16x128xbf16>
    %c0_12 = arith.constant 0 : index
    %c0_13 = arith.constant 0 : index
    %17 = vector.load %arg6[%c0_12, %c0_13] : memref<128x128xbf16, #tpu.memory_space<vmem>>, vector<128x128xbf16>
    %cst_14 = arith.constant dense<0.000000e+00> : vector<16x128xf32>
    %18 = tpu.matmul %16, %17, %cst_14 {dimension_numbers = #tpu.dot_dimension_numbers<[1], [0], [0], [1], [0, 0, 1, 1], [], []>} : vector<16x128xbf16>, vector<128x128xbf16>, vector<16x128xf32> -> vector<16x128xf32>
    %c0_15 = arith.constant 0 : index
    %c0_16 = arith.constant 0 : index
    %19 = vector.load %arg7[%c0_15, %c0_16] : memref<1x128xf32, #tpu.memory_space<vmem>>, vector<1x128xf32>
    %20 = vector.broadcast %19 : vector<1x128xf32> to vector<16x128xf32>
    %21 = arith.addf %18, %20 : vector<16x128xf32>
    %22 = arith.truncf %21 : vector<16x128xf32> to vector<16x128xbf16>
    %c0_17 = arith.constant 0 : index
    %c0_18 = arith.constant 0 : index
    %23 = vector.load %arg8[%c0_17, %c0_18] : memref<16x128xbf16, #tpu.memory_space<vmem>>, vector<16x128xbf16>
    tpu.vector_store %arg8[%c0_17, %c0_18], %22 {strides = array<i32>} : memref<16x128xbf16, #tpu.memory_space<vmem>>, vector<16x128xbf16>,
    return
  }
  func.func @transform_0(%arg0: i32) -> (i32, i32) {
    %c0_i32 = arith.constant 0 : i32
    %c0_i32_0 = arith.constant 0 : i32
    return %arg0, %c0_i32 : i32, i32
  }
  func.func @transform_1(%arg0: i32) -> (i32, i32) {
    %c0_i32 = arith.constant 0 : i32
    %c0_i32_0 = arith.constant 0 : i32
    %c0_i32_1 = arith.constant 0 : i32
    return %c0_i32, %c0_i32_0 : i32, i32
  }
  func.func @transform_2(%arg0: i32) -> (i32, i32) {
    %c0_i32 = arith.constant 0 : i32
    %c0_i32_0 = arith.constant 0 : i32
    %c0_i32_1 = arith.constant 0 : i32
    return %c0_i32, %c0_i32_0 : i32, i32
  }
  func.func @transform_3(%arg0: i32) -> (i32, i32) {
    %c0_i32 = arith.constant 0 : i32
    %c0_i32_0 = arith.constant 0 : i32
    %c0_i32_1 = arith.constant 0 : i32
    return %c0_i32, %c0_i32_0 : i32, i32
  }
  func.func @transform_4(%arg0: i32) -> (i32, i32) {
    %c0_i32 = arith.constant 0 : i32
    %c0_i32_0 = arith.constant 0 : i32
    %c0_i32_1 = arith.constant 0 : i32
    return %c0_i32, %c0_i32_0 : i32, i32
  }
  func.func @transform_5(%arg0: i32) -> (i32, i32) {
    %c0_i32 = arith.constant 0 : i32
    %c0_i32_0 = arith.constant 0 : i32
    %c0_i32_1 = arith.constant 0 : i32
    return %c0_i32, %c0_i32_0 : i32, i32
  }
  func.func @transform_6(%arg0: i32) -> (i32, i32) {
    %c0_i32 = arith.constant 0 : i32
    %c0_i32_0 = arith.constant 0 : i32
    %c0_i32_1 = arith.constant 0 : i32
    return %c0_i32, %c0_i32_0 : i32, i32
  }
  func.func @transform_7(%arg0: i32) -> (i32, i32) {
    %c0_i32 = arith.constant 0 : i32
    %c0_i32_0 = arith.constant 0 : i32
    return %arg0, %c0_i32 : i32, i32
  }
}

</mosaic_0001>

<bundles_post_ra>
// kernel: tpu_custom_call.1
= control target key start
LH: loop header
LB: loop body
LE: loop exit
PB: predicated region body
PF: predicated region fallthrough
CT: control target
= control target key end

     0   :  { %12 = vsyncpa [#allocation3], 0  ;;  %s830_s0 = inlined_call_operand.hbm [shape: bf16[16,32], index: 0, kind: input, shape index: {}]   ;;  %s831_s1 = inlined_call_operand.hbm [shape: bf16[32,256], index: 1, kind: input, shape index: {}]   ;;  %s832_s2 = inlined_call_operand.vmem [shape: f32[1,256], index: 2, kind: input, shape index: {}]   ;;  %s833_s3 = inlined_call_operand.hbm [shape: bf16[256,128], index: 3, kind: input, shape index: {}]   ;;  %s834_s4 = inlined_call_operand.vmem [shape: f32[1,128], index: 4, kind: input, shape index: {}]   ;;  %s835_s5 = inlined_call_operand.hbm [shape: bf16[128,128], index: 5, kind: input, shape index: {}]   ;;  %s836_s6 = inlined_call_operand.vmem [shape: f32[1,128], index: 6, kind: input, shape index: {}]   ;;  %s837_s7 = inlined_call_operand.hbm [shape: bf16[16,128], index: 7, kind: output, shape index: {}]  }
   0x1   :  { %13 = vsyncpa [#allocation6], 0 }
   0x2   :  { %14 = vsyncpa [#allocation9], 0 }
   0x3   :  { %15 = vsyncpa [#allocation4], 0  ;;  %s742_s24 = smov [#allocation5]  }
   0x4   :  { %s33_s25 = sshll.u32 %s742_s24, 4  ;;  %s34_s25 = int_to_ptr.vmem [resolvable:$true] %s33_s25 }
   0x5   :  { %s642_s26 = scalar_lea.vmem %s34_s25, 512  ;;  %p647_p1 = scmp.lt.s32.totalorder %s34_s25, %s34_s25 }
   0x6   :  { %p643_p0 = scmp.ne.s32.totalorder %s34_s25, %s642_s26  ;;  %p648_p2 = scmp.lt.s32.totalorder %s642_s26, %s642_s26 }
   0x8   :  { %p649_p3 = por %p648_p2, %p647_p1 }
   0xa   :  { %p650_p4 = pnand %p649_p3, %p643_p0 }
   0xc   :  { %653 = shalt.err (!%p650_p4)
}
   0xd   :  { %s743_s27 = smov 128   ;;  %s744_s28 = smov 8  }
   0xe   :  { %39 = dma.hbm_to_vmem [thread:$0]  %s831_s1, 512, %s34_s25, [#allocation6], %s743_s27, %s743_s27, %s744_s28  }
   0xf   :  { %s745_s8 = smov [#allocation2]  }
  0x10   :  { %s21_s9 = sshll.u32 %s745_s8, 4  ;;  %s22_s9 = int_to_ptr.vmem [resolvable:$true] %s21_s9 }
  0x11   :  { %s662_s10 = scalar_lea.vmem %s22_s9, 128  ;;  %p667_p6 = scmp.lt.s32.totalorder %s22_s9, %s22_s9 }
  0x12   :  { %p663_p5 = scmp.ne.s32.totalorder %s22_s9, %s662_s10  ;;  %p668_p7 = scmp.lt.s32.totalorder %s662_s10, %s662_s10 }
  0x14   :  { %p669_p8 = por %p668_p7, %p667_p6 }
  0x16   :  { %p670_p9 = pnand %p669_p8, %p663_p5 }
  0x18   :  { %673 = shalt.err (!%p670_p9)
}
  0x19   :  { %s746_s11 = smov 64   ;;  %s747_s12 = smov 4  }
  0x1a   :  { %27 = dma.hbm_to_vmem [thread:$0]  %s830_s0, 128, %s22_s9, [#allocation3], %s746_s11, %s746_s11, %s747_s12  }
  0x1b   :  { %s748_s1 = smov [#allocation7]   ;;  %s749_s16 = smov [#allocation8]  }
  0x1c   :  { %s47_s15 = sshll.u32 %s748_s1, 4  ;;  %s61_s17 = sshll.u32 %s749_s16, 4  ;;  %s48_s15 = int_to_ptr.vmem [resolvable:$true] %s47_s15  ;;  %s62_s17 = int_to_ptr.vmem [resolvable:$true] %s61_s17 }
  0x1d   :  { %s682_s18 = scalar_lea.vmem %s48_s15, 2048  ;;  %p687_p11 = scmp.lt.s32.totalorder %s48_s15, %s48_s15 }
  0x1e   :  { %p683_p10 = scmp.ne.s32.totalorder %s48_s15, %s682_s18  ;;  %p688_p12 = scmp.lt.s32.totalorder %s682_s18, %s682_s18 }
  0x20   :  { %p689_p13 = por %p688_p12, %p687_p11 }
  0x22   :  { %p690_p0 = pnand %p689_p13, %p683_p10 }
  0x24   :  { %693 = shalt.err (!%p690_p0)
}
  0x25   :  { %53 = dma.hbm_to_vmem [thread:$0]  %s833_s3, 2048, %s48_s15, [#allocation6], %s746_s11, %s746_s11, %s747_s12  }
  0x26   :  { %s702_s0 = scalar_lea.vmem %s62_s17, 1024  ;;  %p707_p2 = scmp.lt.s32.totalorder %s62_s17, %s62_s17 }
  0x27   :  { %p703_p1 = scmp.ne.s32.totalorder %s62_s17, %s702_s0  ;;  %p708_p3 = scmp.lt.s32.totalorder %s702_s0, %s702_s0 }
  0x29   :  { %p709_p4 = por %p708_p3, %p707_p2 }
  0x2b   :  { %p710_p5 = pnand %p709_p4, %p703_p1 }
  0x2d   :  { %713 = shalt.err (!%p710_p5)
}
  0x2e   :  { %67 = dma.hbm_to_vmem [thread:$0]  %s835_s5, 1024, %s62_s17, [#allocation9], %s746_s11, %s746_s11, %s747_s12  }
  0x2f   :  { %734 = dma.done.wait [#allocation3], 128  }
  0x30   :  { %735 = vsyncadd [#allocation3], 4294967168 }
  0x31   :  { %736 = dma.done.wait [#allocation6], 2560  }
  0x32   :  { %737 = vsyncadd [#allocation6], 4294964736 }
  0x33   :  { %738 = dma.done.wait [#allocation9], 1024  }
  0x34   :  { %739 = vsyncadd [#allocation9], 4294966272  ;;  %v750_v0 = vmov 0   ;;  %v603_v1 = vld [vmem:[#allocation5 + $0x14] ss:$8 sps:$4 sm:$0xff]   ;;  %vm126_vm0 = vcmask 261120   ;;  %v91_v27 = vlaneseq }
  0x35   :  { %162 = vmatprep.mubr.bf16.mxu0 %v750_v0  ;;  %v605_v2 = vld [vmem:[#allocation5 + $0x10] ss:$8 sps:$4 sm:$0xff]   ;;  %142 = vmatprep.subr.bf16.mxu0 %v603_v1  ;;  %v606_v3 = vld [vmem:[#allocation5 + $0x4] ss:$8 sps:$4 sm:$0xff]   ;;  %v608_v4 = vld [vmem:[#allocation5] ss:$8 sps:$4 sm:$0xff]  }
  0x36   :  { %143 = vmatpush1.bf16.msra.mxu0 %v605_v2  ;;  %v609_v5 = vld [vmem:[#allocation2] sm:$0xff]   ;;  %v612_v8 = vld [vmem:[#allocation7 + $0x70] sm:$0xff]   ;;  %v614_v10 = vld [vmem:[#allocation7 + $0x68] sm:$0xff]   ;;  %v751_v23 = vmov 0.0   ;;  %v92_v28 = vshrl.u32 %v91_v27, 7  ;;  %vm752_vm1 = vmmov 0  }
  0x37   :  { %144 = vmatprep.subr.bf16.mxu0 %v606_v3  ;;  %v610_v6 = vld [vmem:[#allocation7 + $0x78] sm:$0xff]   ;;  %v613_v9 = vld [vmem:[#allocation7 + $0x30] sm:$0xff]   ;;  %v615_v11 = vld [vmem:[#allocation7 + $0x28] sm:$0xff]   ;;  %s753_s26 = smov [#allocation10]  }
  0x38   :  { %v611_v7 = vld [vmem:[#allocation7 + $0x38] sm:$0xff]   ;;  %540 = vmatprep.subr.bf16.mxu1 %v610_v6  ;;  %v616_v12 = vld [vmem:[#allocation7 + $0x60] sm:$0xff]   ;;  %v620_v16 = vld [vmem:[#allocation7 + $0x50] sm:$0xff]   ;;  %v97_v29 = vsub.s32 1, %v92_v28  ;;  %v93_v30 = vsub.s32 0, %v92_v28  ;;  %s485_s27 = sshll.u32 %s753_s26, 4  ;;  %s486_s27 = int_to_ptr.vmem [resolvable:$true] %s485_s27 }
  0x39   :  { %541 = vmatpush3.bf16.msra.mxu1 %v611_v7  ;;  %v617_v13 = vld [vmem:[#allocation7 + $0x20] sm:$0xff]   ;;  %v618_v14 = vld [vmem:[#allocation7 + $0x58] sm:$0xff]   ;;  %v621_v17 = vld [vmem:[#allocation7 + $0x10] sm:$0xff]   ;;  %p719_p7 = scmp.lt.s32.totalorder %s486_s27, %s486_s27 }
  0x3a   :  { %145 = vmatpush1.bf16.msra.mxu0 %v608_v4  ;;  %542 = vmatprep.subr.bf16.mxu1 %v612_v8  ;;  %v619_v15 = vld [vmem:[#allocation7 + $0x18] sm:$0xff]   ;;  %v622_v18 = vld [vmem:[#allocation7 + $0x48] sm:$0xff]   ;;  %v624_v20 = vld [vmem:[#allocation7 + $0x40] sm:$0xff]  }
  0x3b   :  { %v623_v19 = vld [vmem:[#allocation7 + $0x8] sm:$0xff]   ;;  %v625_v21 = vld [vmem:[#allocation7] sm:$0xff]   ;;  %v626_v22 = vld [vmem:[#allocation8 + $0x38] sm:$0xff]   ;;  %571 = vmatprep.subr.bf16.mxu0 %v751_v23 }
  0x3c   :  { %v627_v24 = vld [vmem:[#allocation8 + $0x30] sm:$0xff]   ;;  %v628_v25 = vld [vmem:[#allocation8 + $0x28] sm:$0xff]   ;;  %v629_v26 = vld [vmem:[#allocation8 + $0x20] sm:$0xff]  }
  0x3d   :  { %504 = vmatmul.mubr.msk.bf16.vlgmr.msra.gmra.mxu0 %vm126_vm0, %v609_v5  ;;  %543 = vmatpush3.bf16.msra.mxu1 %v613_v9  ;;  %v89_v31 = vld [vmem:[%s832_s2] sm:$0x3]  ;;  %v631_v49 = vld [vmem:[#allocation8 + $0x10] sm:$0xff]   ;;  %v632_v50 = vld [vmem:[#allocation8 + $0x8] sm:$0xff]  }
  0x3e   :  { %544 = vmatprep.subr.bf16.mxu1 %v614_v10  ;;  %572 = vmatpush3.bf16.msra.mxu0 %v626_v22  ;;  %v98_v33 = vrot.slane %v89_v31, %v97_v29  ;;  %v94_v34 = vrot.slane %v89_v31, %v93_v30  ;;  %v630_v48 = vld [vmem:[#allocation8 + $0x18] sm:$0xff]   ;;  %v633_v51 = vld [vmem:[#allocation8] sm:$0xff]  }
  0x3f   :  { %573 = vmatprep.subr.bf16.mxu0 %v751_v23  ;;  %587 = vmatprep.mubr.msk.bf16.mxu0 %vm752_vm1, %v751_v23  ;;  %v505_v55 = vld [vmem:[%s834_s4] ss:$0 sm:$0xff]  ;;  %s714_s4 = scalar_lea.vmem %s486_s27, 128 }
  0x40   :  { %v522_v1 = vld [vmem:[%s836_s6] ss:$0 sm:$0xff]  ;;  %p715_p6 = scmp.ne.s32.totalorder %s486_s27, %s714_s4  ;;  %p720_p8 = scmp.lt.s32.totalorder %s714_s4, %s714_s4 }
  0x41   :  { %545 = vmatpush3.bf16.msra.mxu1 %v615_v11 }
  0x42   :  { %546 = vmatprep.subr.bf16.mxu1 %v616_v12  ;;  %574 = vmatpush3.bf16.msra.mxu0 %v627_v24  ;;  %p721_p9 = por %p720_p8, %p719_p7 }
  0x43   :  { %575 = vmatprep.subr.bf16.mxu0 %v751_v23 }
  0x44   :  { %p722_p10 = pnand %p721_p9, %p715_p6 }
  0x45   :  { %547 = vmatpush3.bf16.msra.mxu1 %v617_v13 }
  0x46   :  { %548 = vmatprep.subr.bf16.mxu1 %v618_v14  ;;  %576 = vmatpush3.bf16.msra.mxu0 %v628_v25 }
  0x47   :  { %577 = vmatprep.subr.bf16.mxu0 %v751_v23 }
  0x49   :  { %549 = vmatpush3.bf16.msra.mxu1 %v619_v15 }
  0x4a   :  { %550 = vmatprep.subr.bf16.mxu1 %v620_v16  ;;  %578 = vmatpush3.bf16.msra.mxu0 %v629_v26 }
  0x4b   :  { %579 = vmatprep.subr.bf16.mxu0 %v751_v23 }
  0x4d   :  { %551 = vmatpush3.bf16.msra.mxu1 %v621_v17 }
  0x4e   :  { %552 = vmatprep.subr.bf16.mxu1 %v622_v18  ;;  %580 = vmatpush3.bf16.msra.mxu0 %v630_v48 }
  0x4f   :  { %581 = vmatprep.subr.bf16.mxu0 %v751_v23 }
  0x51   :  { %553 = vmatpush3.bf16.msra.mxu1 %v623_v19 }
  0x52   :  { %554 = vmatprep.subr.bf16.mxu1 %v624_v20  ;;  %582 = vmatpush3.bf16.msra.mxu0 %v631_v49 }
  0x53   :  { %583 = vmatprep.subr.bf16.mxu0 %v751_v23 }
  0x55   :  { %555 = vmatpush3.bf16.msra.mxu1 %v625_v21 }
  0x56   :  { %584 = vmatpush3.bf16.msra.mxu0 %v632_v50 }
  0x57   :  { %585 = vmatprep.subr.bf16.mxu0 %v751_v23 }
  0x5a   :  { %586 = vmatpush3.bf16.msra.mxu0 %v633_v51 }
  0xfd   :  { %v164_v32 = vpop.f32.mrf.mxu0 }
  0xfe   :  { %v165_v39 = vadd.f32 %v164_v32, %v94_v34 }
  0xff   :  { %v166_v35 = vpop.f32.mrf.mxu0 }
 0x100   :  { %v167_v37 = vadd.f32 %v166_v35, %v98_v33  ;;  %v173_v45 = vmax.f32 %v165_v39, 0.0 }
 0x101   :  { %v168_v36 = vpop.f32.mrf.mxu0 }
 0x102   :  { %v169_v38 = vadd.f32 %v168_v36, %v94_v34  ;;  %v174_v43 = vmax.f32 %v167_v37, 0.0 }
 0x103   :  { %v170_v40 = vpop.f32.mrf.mxu0 }
 0x104   :  { %v171_v41 = vadd.f32 %v170_v40, %v98_v33  ;;  %v175_v42 = vmax.f32 %v169_v38, 0.0 }
 0x106   :  { %v176_v44 = vmax.f32 %v171_v41, 0.0  ;;  %v177_v47 = vpack.c.bf16 %v175_v42, %v173_v45 }
 0x108   :  { %v178_v46 = vpack.c.bf16 %v176_v44, %v174_v43 }
 0x10a   :  { %346 = vmatprep.mubr.bf16.mxu1 %v178_v46 }
 0x10b   :  { %347 = vmatmul.mubr.bf16.vlgmr.msra.gmra.mxu1 %v177_v47 }
 0x1cb   :  { %v556_v52 = vpop.f32.mrf.mxu1 }
 0x1cd   :  { %v557_v53 = vpop.f32.mrf.mxu1 }
 0x1ce   :  { %v558_v54 = vadd.f32 %v557_v53, %v556_v52 }
 0x1cf   :  { %v559_v56 = vpop.f32.mrf.mxu1 }
 0x1d0   :  { %v349_v58 = vadd.f32 %v558_v54, %v505_v55 }
 0x1d1   :  { %v560_v57 = vpop.f32.mrf.mxu1 }
 0x1d2   :  { %v561_v59 = vadd.f32 %v560_v57, %v559_v56  ;;  %v355_v61 = vmax.f32 %v349_v58, 0.0 }
 0x1d4   :  { %v352_v60 = vadd.f32 %v561_v59, %v505_v55 }
 0x1d6   :  { %v356_v62 = vmax.f32 %v352_v60, 0.0 }
 0x1d8   :  { %v357_v63 = vpack.c.bf16 %v356_v62, %v355_v61 }
 0x1da   :  { %588 = vmatmul.mubr.bf16.vlgmr.msra.gmra.mxu0 %v357_v63 }
 0x29a   :  { %v463_v0 = vpop.f32.mrf.mxu0 }
 0x29b   :  { %v464_v4 = vadd.f32 %v522_v1, %v463_v0 }
 0x29c   :  { %v589_v2 = vpop.f32.mrf.mxu0 }
 0x29e   :  { %v466_v3 = vpop.f32.mrf.mxu0 }
 0x29f   :  { %v467_v5 = vadd.f32 %v522_v1, %v466_v3 }
 0x2a0   :  { %v590_v6 = vpop.f32.mrf.mxu0 }
 0x2a1   :  { %v538_v7 = vpack.c.bf16 %v467_v5, %v464_v4 }
 0x2a3   :  { %539 = vst [vmem:[#allocation10] sm:$0xff] %v538_v7  }
 0x2a4   :  { %725 = shalt.err (!%p722_p10)
}
 0x2a5   :  { %491 = dma.vmem_to_hbm [thread:$0]  %s486_s27, 128, %s837_s7, [#allocation4], %s746_s11, %s746_s11, %s747_s12  }
 0x2a6   :  { %740 = dma.done.wait [#allocation4], 128  }
 0x2a7   :  { %741 = vsyncadd [#allocation4], 4294967168 }
 0x2a8   :  { %495 = vsyncpa [#allocation3], 1 }
 0x2a9   :  { %496 = vsyncpa [#allocation6], 1 }
 0x2aa   :  { %497 = vsyncpa [#allocation9], 1 }
 0x2ab   :  { %498 = vsyncpa [#allocation4], 1 }

</bundles_post_ra>
